<compile_context>
chip_gen: v7x
topology: tpu7x:2x2x1
jax: 0.10.0
libtpu: 0.0.40
codegen_flags: <defaults>
</compile_context>

<pallas_src>
import jax
import jax.numpy as jnp
from jax import lax
from jax.experimental import pallas as pl
from jax.experimental.pallas import tpu as pltpu


def nsp_head_kernel(x_ref, w_ref, b_ref, o_ref):
    # x_ref: (TB, H) VMEM — streamed batch tile of pooled_output
    # w_ref: (2, H)  VMEM — resident weight (PyTorch layout, H lane-dense)
    # b_ref: (1, 2)  VMEM — resident bias
    # o_ref: (TB, 2) VMEM — output tile
    x = x_ref[...]
    w = w_ref[...]
    # Contract over H without transposing the weight (keeps H on the lane axis).
    score = lax.dot_general(
        x, w,
        dimension_numbers=(((1,), (1,)), ((), ())),
        preferred_element_type=jnp.float32,
    )
    o_ref[...] = (score + b_ref[...]).astype(o_ref.dtype)


def _round_up(x, m):
    return ((x + m - 1) // m) * m


def _pick_batch_tile(B, H, block_b, vmem_budget_bytes):
    """Pick a batch tile size TB.

    Rules:
      * Tiny batch (B <= 8): one full-dim block (exempt from the (8,128) rule).
      * Otherwise: at least 2 grid steps (so v7x megacore has something to
        shard), tile a multiple of 8, capped at block_b.
      * Shrink until double-buffered x + lane-padded output buffers fit the
        VMEM budget (keeps double-buffering alive on v5e/v7x).
    """
    if B <= 8:
        return B
    tb = min(block_b, _round_up(pl.cdiv(B, 2), 8))

    def stream_bytes(t):
        # 2 buffers for the x stream + 2 buffers for the (t, 2)->(t, 128)
        # lane-padded output, all f32.
        return 2 * t * H * 4 + 2 * t * 128 * 4

    while tb > 8 and stream_bytes(tb) > vmem_budget_bytes:
        tb = max(8, _round_up(tb // 2, 8))
    return tb


def bert_only_nsp_head(pooled_output, weight, bias, *, block_b=2048):
    """BertOnlyNSPHead forward: pooled_output @ weight.T + bias.

    pooled_output: [B, H]; weight: [2, H] (PyTorch nn.Linear layout); bias: [2].
    """
    B, H = pooled_output.shape
    assert weight.shape == (2, H), "weight must be in PyTorch [2, H] layout"
    b2d = bias.reshape(1, 2)  # keep >= 2D for TPU VMEM layout

    # Conservative streaming-buffer budget (safe on v5e/v6e/v7x once the
    # scoped limit is raised to 32 MiB below; leaves headroom for the resident
    # weight/bias and compiler scratch).
    vmem_budget_bytes = 24 * 1024 * 1024
    tb = _pick_batch_tile(B, H, block_b, vmem_budget_bytes)
    grid = (pl.cdiv(B, tb),)

    # Advisory cost: one pass over pooled_output dominates; 2*B*H*2 MACs.
    cost = pl.CostEstimate(
        flops=4 * B * H,
        transcendentals=0,
        bytes_accessed=B * H * 4 + B * 2 * 4 + 2 * H * 4 + 2 * 4,
    )

    return pl.pallas_call(
        nsp_head_kernel,
        out_shape=jax.ShapeDtypeStruct((B, 2), pooled_output.dtype),
        grid_spec=pltpu.PrefetchScalarGridSpec(
            num_scalar_prefetch=0,
            grid=grid,
            in_specs=[
                pl.BlockSpec((tb, H), lambda i: (i, 0)),   # streamed x tiles
                pl.BlockSpec((2, H), lambda i: (0, 0)),    # resident weight
                pl.BlockSpec((1, 2), lambda i: (0, 0)),    # resident bias
            ],
            out_specs=pl.BlockSpec((tb, 2), lambda i: (i, 0)),
        ),
        compiler_params=pltpu.CompilerParams(
            # Parallel batch axis -> v7x shards tiles across its 2 TensorCores.
            dimension_semantics=("parallel",),
            # Large tiles stay double-buffered on v5e (16 MiB scoped default)
            # while staying within v7x's 64 MiB physical per-TC VMEM.
            vmem_limit_bytes=32 * 1024 * 1024,
        ),
        cost_estimate=cost,
    )(pooled_output, weight, b2d)


if __name__ == "__main__":
    batch, hidden = 24, 32  # small; exercises the >=2-step grid + edge block

    key = jax.random.PRNGKey(0)
    k_x, k_w, k_b = jax.random.split(key, 3)

    pooled_output = jax.random.normal(k_x, (batch, hidden), dtype=jnp.float32)
    # Deterministic "Linear(hidden, 2)" params (PyTorch layout: weight [2, hidden])
    weight = jax.random.normal(k_w, (2, hidden), dtype=jnp.float32) * 0.02
    bias = jax.random.normal(k_b, (2,), dtype=jnp.float32) * 0.02

    out = bert_only_nsp_head(pooled_output, weight, bias)
    out = jax.block_until_ready(out)

    # Pure-JAX reference check
    ref = pooled_output @ weight.T + bias
    assert out.shape == (batch, 2)
    assert jnp.allclose(out, ref, atol=1e-5, rtol=1e-5)

    print("KERNEL_OK")
</pallas_src>

<mosaic_0001>
module attributes {stable_mosaic.version = 11 : i64} {
  func.func @nsp_head_kernel(%arg0: i32, %arg1: memref<16x32xf32, #tpu.memory_space<vmem>>, %arg2: memref<2x32xf32, #tpu.memory_space<vmem>>, %arg3: memref<1x2xf32, #tpu.memory_space<vmem>>, %arg4: memref<16x2xf32, #tpu.memory_space<vmem>>) attributes {dimension_semantics = [#tpu.dimension_semantics<parallel>], iteration_bounds = array<i64: 2>, scalar_prefetch = 0 : i64, scratch_operands = 0 : i64, tpu.core_type = #tpu.core_type<tc>, window_params = [{transform_indices = @transform_0, window_bounds = array<i64: 16, 32>}, {pipeline_mode = #tpu.pipeline_mode<synchronous>, transform_indices = @transform_1, window_bounds = array<i64: 2, 32>}, {pipeline_mode = #tpu.pipeline_mode<synchronous>, transform_indices = @transform_2, window_bounds = array<i64: 1, 2>}, {transform_indices = @transform_3, window_bounds = array<i64: 16, 2>}]} {
    %c0 = arith.constant 0 : index
    %c0_0 = arith.constant 0 : index
    %0 = vector.load %arg1[%c0, %c0_0] : memref<16x32xf32, #tpu.memory_space<vmem>>, vector<16x32xf32>
    %c0_1 = arith.constant 0 : index
    %c0_2 = arith.constant 0 : index
    %1 = vector.load %arg2[%c0_1, %c0_2] : memref<2x32xf32, #tpu.memory_space<vmem>>, vector<2x32xf32>
    %cst = arith.constant dense<0.000000e+00> : vector<16x2xf32>
    %2 = tpu.matmul %0, %1, %cst {dimension_numbers = #tpu.dot_dimension_numbers<[1], [1], [0], [0], [0, 0, 1, 0], [], []>} : vector<16x32xf32>, vector<2x32xf32>, vector<16x2xf32> -> vector<16x2xf32>
    %c0_3 = arith.constant 0 : index
    %c0_4 = arith.constant 0 : index
    %3 = vector.load %arg3[%c0_3, %c0_4] : memref<1x2xf32, #tpu.memory_space<vmem>>, vector<1x2xf32>
    %4 = vector.broadcast %3 : vector<1x2xf32> to vector<16x2xf32>
    %5 = arith.addf %2, %4 : vector<16x2xf32>
    %c0_5 = arith.constant 0 : index
    %c0_6 = arith.constant 0 : index
    %6 = vector.load %arg4[%c0_5, %c0_6] : memref<16x2xf32, #tpu.memory_space<vmem>>, vector<16x2xf32>
    tpu.vector_store %arg4[%c0_5, %c0_6], %5 {strides = array<i32>} : memref<16x2xf32, #tpu.memory_space<vmem>>, vector<16x2xf32>,
    return
  }
  func.func @transform_0(%arg0: i32) -> (i32, i32) {
    %c0_i32 = arith.constant 0 : i32
    %c0_i32_0 = arith.constant 0 : i32
    return %arg0, %c0_i32 : i32, i32
  }
  func.func @transform_1(%arg0: i32) -> (i32, i32) {
    %c0_i32 = arith.constant 0 : i32
    %c0_i32_0 = arith.constant 0 : i32
    %c0_i32_1 = arith.constant 0 : i32
    return %c0_i32, %c0_i32_0 : i32, i32
  }
  func.func @transform_2(%arg0: i32) -> (i32, i32) {
    %c0_i32 = arith.constant 0 : i32
    %c0_i32_0 = arith.constant 0 : i32
    %c0_i32_1 = arith.constant 0 : i32
    return %c0_i32, %c0_i32_0 : i32, i32
  }
  func.func @transform_3(%arg0: i32) -> (i32, i32) {
    %c0_i32 = arith.constant 0 : i32
    %c0_i32_0 = arith.constant 0 : i32
    return %arg0, %c0_i32 : i32, i32
  }
}

</mosaic_0001>

<bundles_post_ra>
// kernel: tpu_custom_call.1
= control target key start
LH: loop header
LB: loop body
LE: loop exit
PB: predicated region body
PF: predicated region fallthrough
CT: control target
= control target key end

     0   :  { %8 = vsyncpa [#allocation3], 0  ;;  %s973_s0 = inlined_call_operand.hbm [shape: f32[24,32], index: 0, kind: input, shape index: {}]   ;;  %s974_s1 = inlined_call_operand.vmem [shape: f32[2,32], index: 1, kind: input, shape index: {}]   ;;  %s975_s2 = inlined_call_operand.vmem [shape: f32[1,2], index: 2, kind: input, shape index: {}]   ;;  %s976_s3 = inlined_call_operand.vmem [shape: f32[24,2], index: 3, kind: output, shape index: {}]  }
   0x1   :  { %10 = vsyncpa [#allocation3 + $0x1], 0  ;;  %s825_s12 = smov 0   ;;  %s827_s13 = smov 0  }
   0x2   :  { %s829_s14 = smov 0   ;;  %s831_s15 = smov 0  }
   0x3 LB: > { %s844_s16 = sadd.s32 4294967295, %s768_s15   ;;  %s847_s17 = sadd.s32 1, %s768_s15   ;;  %s768_s15 = sphi %s831_s15, %s982_s15   ;;  %s764_s14 = sphi %s829_s14, %s981_s14   ;;  %s760_s13 = sphi %s827_s13, %s980_s13   ;;  %s756_s12 = sphi %s825_s12, %s979_s12  }
   0x4   : > { %s20_s18 = ssub.s32 %s768_s15, %s847_s17  ;;  %s23_s19 = sadd.s32 1, %s764_s14 }
   0x5   : > { %p21_p0 = scmp.eq.s32.totalorder %s20_s18, 0  ;;  %p30_p1 = scmp.ne.s32.totalorder %s764_s14, %s760_s13 }
   0x6   : > { %p31_p2 = scmp.eq.s32.totalorder %s768_s15, 0  ;;  %p36_p3 = scmp.ne.s32.totalorder %s760_s13, %s756_s12 }
   0x7   : > { %s857_s20 = scalar_select %p21_p0, %s764_s14, %s23_s19  }
   0x8   : > { %p32_p4 = por %p31_p2, %p30_p1  ;;  %p37_p5 = scmp.eq.s32.totalorder %s844_s16, 0 }
   0x9   : > { %p102_p6 = scmp.eq.s32.totalorder %s844_s16, 1  ;;  %p531_p9 = scmp.ge.s32.totalorder %s768_s15, 2 }
   0xa   : > { %p861_p7 = por %p37_p5, %p36_p3 }
   0xb   : > { %p865_p8 = por %p102_p6, %p30_p1  ;;  %130 = sbr.rel (%p531_p9) target bundleno = 53 (0x35), region = 24 }
  0x12   : > { %133 = sbr.rel (!%p32_p4) target bundleno = 53 (0x35), region = 28  ;;  %s134_s23 = sand.u32 (%p32_p4), 1, %s764_s14  }
  0x13   : > { %s533_s24 = sshll.u32 (%p32_p4), %s768_s15, 1  ;;  %s532_s25 = sshll.u32 (%p32_p4), %s134_s23, 4 }
  0x14   : > { %s140_s26 = ssub.s32 (%p32_p4), 3, %s533_s24  ;;  %s875_s29 = scalar_lea.sflag (%p32_p4), [#allocation3], %s134_s23 }
  0x15   : > { %p141_p10 = scmp.lt.s32.totalorder (%p32_p4), %s140_s26, 2  ;;  %s138_s30 = scalar_lea.vmem (%p32_p4), [#allocation2], %s532_s25 }
  0x19   : > { %s984_s26 = smov (!%p141_p10, %s140_s26), 2 }
  0x1a   : > { %s872_s27 = sshll.u32 %s984_s26, 7 }
  0x1b   : > { %s145_s28 = ssub.s32 256, %s872_s27 }
  0x1c   : > { %146 = vsyncadd %s875_s29, %s145_s28  ;;  %p535_p11 = scmp.ne.s32.totalorder %s872_s27, 0  ;;  %s563_s4 = sshll.u32 %s768_s15, 8 }
  0x1d   : > { %s883_s7 = scalar_lea.hbm %s973_s0, %s563_s4  ;;  %s151_s8 = sshll.u32 %s138_s30, 4  ;;  %s885_s8 = int_to_ptr.vmem [resolvable:$true] %s151_s8 }
  0x1e   : > { %s674_s9 = scalar_lea.hbm %s883_s7, %s872_s27  ;;  %s678_s12 = scalar_lea.hbm %s973_s0, 384 }
  0x1f   : > { %p675_p12 = scmp.ne.s32.totalorder %s883_s7, %s674_s9  ;;  %p679_p1 = scmp.lt.u32.totalorder %s883_s7, %s973_s0 }
  0x20   : > { %p680_p2 = scmp.lt.u32.totalorder %s678_s12, %s674_s9  ;;  %p682_p4 = scmp.lt.u32.totalorder %s674_s9, %s883_s7 }
  0x21   : > { %p676_p13 = pnand %p675_p12, %p535_p11 }
  0x22   : > { %p681_p3 = por %p680_p2, %p679_p1 }
  0x23   : > { %p677_p0 = pneg %p676_p13 }
  0x24   : > { %p683_p5 = por %p682_p4, %p681_p3 }
  0x26   : > { %p684_p6 = pnand %p683_p5, %p677_p0 }
  0x28   : > { %687 = shalt.err (!%p684_p6)
}
  0x29   : > { %s688_s23 = scalar_lea.vmem %s885_s8, %s872_s27  ;;  %s802_s24 = smov [#allocation2]  }
  0x2a   : > { %p689_p9 = scmp.ne.s32.totalorder %s885_s8, %s688_s23  ;;  %s692_s25 = sshll.u32 %s802_s24, 4  ;;  %s693_s25 = int_to_ptr.vmem [resolvable:$false] %s692_s25 }
  0x2b   : > { %s694_s26 = scalar_lea.vmem %s693_s25, 512  ;;  %p695_p13 = scmp.lt.s32.totalorder %s885_s8, %s693_s25 }
  0x2c   : > { %p690_p10 = pnand %p689_p9, %p535_p11  ;;  %p696_p1 = scmp.lt.s32.totalorder %s694_s26, %s688_s23 }
  0x2e   : > { %p691_p12 = pneg %p690_p10  ;;  %p697_p2 = por %p696_p1, %p695_p13 }
  0x30   : > { %p698_p3 = pnand %p697_p2, %p691_p12 }
  0x32   : > { %701 = shalt.err (!%p698_p3)
}
  0x33   : > { %s803_s28 = smov 128   ;;  %s804_s30 = smov 8  }
  0x34   : > { %157 = dma.hbm_to_vmem [thread:$0]  (%p535_p11), %s883_s7, %s872_s27, %s885_s8, %s875_s29, %s803_s28, %s803_s28, %s804_s30  }
  0x35 PF: > { %p539_p0 = scmp.ge.s32.totalorder %s768_s15, 1  ;;  %p159_p4 = scmp.lt.s32.totalorder %s768_s15, 3 }
  0x37   : > { %p160_p5 = pnand %p539_p0, %p159_p4 }
  0x38   : > { %s165_s4 = sand.u32 (!%p160_p5), 1, %s760_s13  }
  0x39   : > { %163 = sbr.rel (%p160_p5) target bundleno = 335 (0x14f), region = 32  ;;  %s540_s5 = sshll.u32 (!%p160_p5), %s165_s4, 4 }
  0x3a   : > { %s166_s6 = scalar_lea.sflag (!%p160_p5), [#allocation3], %s165_s4  ;;  %s169_s9 = scalar_lea.vmem (!%p160_p5), [#allocation2], %s540_s5 }
  0x40   : > { %751 = dma.done.wait (%p861_p7), %s166_s6, 256  }
  0x41   : > { %753 = vsyncadd (%p861_p7), %s166_s6, 4294967040  ;;  %vm211_vm0 = vcmask 261120   ;;  %v203_v0 = vld [vmem:[%s974_s1] sm:$0x3]  ;;  %v201_v1 = vld [vmem:[%s169_s9] sm:$0xff]  ;;  %vm296_vm1 = vcmask 15360  }
  0x42   : > { %570 = vmatprep.subr.msk.mxu0 %vm211_vm0, %v203_v0  ;;  %572 = vmatprep.mubr.msk.f32.mxu0 %vm211_vm0, %v201_v1  ;;  %v202_v2 = vld [vmem:[%s169_s9 + $0x8] sm:$0xff]  ;;  %s925_s21 = scalar_lea.vmem [#allocation4], %s540_s5   ;;  %s547_s8 = sshll.u32 (%p865_p8), %s844_s16, 1 }
  0x43   : > { %571 = vmatpush3.xpose.msk.msra.mxu0 %vm211_vm0, %v203_v0  ;;  %v542_v3 = vld [vmem:[%s975_s2] ss:$0 sm:$0xff]  ;;  %s564_s10 = sshll.u32 (%p865_p8), %s844_s16, 4  ;;  %s307_s11 = ssub.s32 (%p865_p8), 3, %s547_s8 }
  0x44   : > { %s936_s19 = scalar_lea.vmem (%p865_p8), %s976_s3, %s564_s10   ;;  %p308_p7 = scmp.lt.s32.totalorder (%p865_p8), %s307_s11, 2 }
  0x46   : > { %573 = vmatmul.mubr.msk.f32.vlgmr.msra.gmra.mrb[0].mxu0 %vm211_vm0, %v202_v2 }
 0x117   : > { %305 = sbr.rel (!%p865_p8) target bundleno = 335 (0x14f), region = 40 }
 0x119   : > { %v574_v4 = vpop.f32.mrb[0].mxu0 }
 0x11a   : > { %v293_v5 = vadd.f32 %v574_v4, %v542_v3  ;;  %v287_v6 = vpop.f32.mrb[1].mxu0 }
 0x11b   : > { %v288_v7 = vadd.f32 %v542_v3, %v287_v6 }
 0x11c   : > { %298 = vst.msk [vmem:[%s925_s21 + $0x8] sm:$0xff] %vm296_vm1, %v293_v5 }
 0x11d   : > { %297 = vst.msk [vmem:[%s925_s21] sm:$0xff] %vm296_vm1, %v288_v7 }
 0x11e   : > { %s986_s11 = smov (!%p308_p7, %s307_s11), 2 }
 0x11f   : > { %s548_s23 = sshll.u32 %s986_s11, 7 }
 0x120   : > { %p551_p11 = scmp.eq.s32.totalorder %s548_s23, 0 }
 0x121   : > { %s942_s22 = sshrl.u32 (!%p551_p11), %s986_s11, 1 }
 0x122   : > { %316 = sbr.rel (%p551_p11) target bundleno = 335 (0x14f), region = 44  ;;  %p552_p8 = scmp.le.s32.totalorder (!%p551_p11), %s942_s22, 0 }
 0x129   : > { %482 = sbr.rel (%p552_p8) target bundleno = 314 (0x13a), region = 126  ;;  %s770_s16 = smov (!%p552_p8), %s936_s19  }
 0x12a   : > { %s774_s24 = smov (!%p552_p8), %s925_s21   ;;  %s778_s25 = smov (!%p552_p8), 0  }
 0x12b   : > { %s782_s26 = smov (!%p552_p8), 0  }
 0x130 LB: >> { %v380_v8 = vld [vmem:[%s776_s24] sm:$0xff]  ;;  %v382_v9 = vld [vmem:[%s776_s24 + $0x8] sm:$0xff]  ;;  %s384_s28 = sadd.s32 1, %s780_s25  ;;  %s374_s26 = sadd.s32 1, %s784_s26   ;;  %s784_s26 = sphi %s782_s26, %s374_s26   ;;  %s780_s25 = sphi %s778_s25, %s779_s25   ;;  %s776_s24 = sphi %s774_s24, %s389_s24   ;;  %s772_s16 = sphi %s770_s16, %s390_s16  }
 0x131   : >> { %381 = vst [vmem:[%s772_s16] sm:$0xff] %v380_v8  ;;  %383 = vst [vmem:[%s772_s16 + $0x8] sm:$0xff] %v382_v9  ;;  %p385_p6 = scmp.ge.s32.totalorder %s384_s28, %s942_s22  ;;  %p373_p9 = scmp.ge.s32.totalorder %s374_s26, %s942_s22 }
 0x133   : >> { %s988_s28 = smov (%p385_p6, %s384_s28), 0  ;;  %376 = sbr.rel (!%p373_p9) target bundleno = 304 (0x130), region = 132 }
 0x134   : >> { %s553_s30 = sshll.u32 %s988_s28, 4  ;;  %s779_s25 = smov %s988_s28  }
 0x135   : >> { %s389_s24 = scalar_lea.vmem %s925_s21, %s553_s30 [#allocation4]   ;;  %s390_s16 = scalar_lea.vmem %s936_s19, %s553_s30  }
 0x13a PF: > { %s952_s4 = sand.u32 1, %s986_s11   ;;  %s565_s5 = sshll.u32 %s942_s22, 4 }
 0x13b   : > { %s395_s6 = scalar_lea.vmem %s925_s21, %s565_s5 [#allocation4]   ;;  %s397_s9 = scalar_lea.vmem %s936_s19, %s565_s5  }
 0x13c   : > { %p558_p10 = scmp.le.s32.totalorder %s952_s4, 0 }
 0x13d   : > { %s786_s27 = smov (!%p558_p10), %s397_s9   ;;  %s790_s29 = smov (!%p558_p10), %s395_s6  }
 0x13e   : > { %496 = sbr.rel (%p558_p10) target bundleno = 335 (0x14f), region = 137  ;;  %s794_s15 = smov (!%p558_p10), 0  }
 0x13f   : > { %s798_s7 = smov (!%p558_p10), 0  }
 0x145 LB: >> { %v407_v10 = vld [vmem:[%s792_s29] sm:$0xff]  ;;  %s409_s8 = sadd.s32 1, %s796_s15  ;;  %s401_s7 = sadd.s32 1, %s800_s7   ;;  %s800_s7 = sphi %s798_s7, %s401_s7   ;;  %s796_s15 = sphi %s794_s15, %s795_s15   ;;  %s792_s29 = sphi %s790_s29, %s414_s29   ;;  %s788_s27 = sphi %s786_s27, %s415_s27  }
 0x146   : >> { %408 = vst [vmem:[%s788_s27] sm:$0xff] %v407_v10  ;;  %p410_p12 = scmp.ge.s32.totalorder %s409_s8, %s952_s4  ;;  %p400_p13 = scmp.ge.s32.totalorder %s401_s7, %s952_s4 }
 0x148   : >> { %s990_s8 = smov (%p410_p12, %s409_s8), 0  ;;  %403 = sbr.rel (!%p400_p13) target bundleno = 325 (0x145), region = 143 }
 0x149   : >> { %s559_s21 = sshll.u32 %s990_s8, 3  ;;  %s795_s15 = smov %s990_s8  }
 0x14a   : >> { %s414_s29 = scalar_lea.vmem %s395_s6, %s559_s21 [#allocation4]   ;;  %s415_s27 = scalar_lea.vmem %s397_s9, %s559_s21  }
 0x14f PF: > { %p13_p1 = scmp.ge.s32.totalorder %s847_s17, 4   ;;  %s979_s12 = smov %s760_s13 }
 0x150   : > { %s980_s13 = smov %s764_s14  ;;  %s981_s14 = smov %s857_s20 }
 0x151   : > { %s982_s15 = smov %s847_s17  ;;  %15 = sbr.rel (!%p13_p1) target bundleno = 3 (0x3), region = 154 }
 0x158   :  { %431 = vsyncpa [#allocation3], 1 }
 0x159   :  { %433 = vsyncpa [#allocation3 + $0x1], 1 }

</bundles_post_ra>
